<compile_context>
chip_gen: v7x
topology: tpu7x:2x2x1
jax: 0.10.0
libtpu: 0.0.40
codegen_flags: <defaults>
</compile_context>

<pallas_src>
import functools

import jax
import jax.numpy as jnp
from jax.experimental import pallas as pl
from jax.experimental.pallas import tpu as pltpu


def _round_up(v, m):
    return ((v + m - 1) // m) * m


def _matvec(x, w):
    """(rows, k) @ (k, 1) -> (rows, 1) with f32 accumulation (static shapes)."""
    k = x.shape[1]
    if k < 8:
        # Degenerate contraction dim (e.g. the module default p = 1): plain
        # VPU multiply-adds; avoids a pathological 1-wide MXU matmul.
        x = x.astype(jnp.float32)
        w = w.astype(jnp.float32)
        acc = x[:, 0:1] * w[0:1, :]
        for j in range(1, k):
            acc = acc + x[:, j:j + 1] * w[j:j + 1, :]
        return acc
    return jnp.dot(x, w, preferred_element_type=jnp.float32)


def _linear_kernel(x_ref, w_ref, b_ref, o_ref):
    # x_ref: (TILE_N, P)  VMEM row tile (tail tile may be partial; its garbage
    #                     rows are never stored back).
    # w_ref: (P, 1)       VMEM, constant index_map -> resident across steps.
    # b_ref: (1, 1)       SMEM scalar.
    # o_ref: (TILE_N, 1)  f32 VMEM.
    o_ref[...] = _matvec(x_ref[...], w_ref[...]) + b_ref[0, 0]


def _linear_ktiled_kernel(x_ref, w_ref, b_ref, o_ref, acc_ref, *, p, tile_k):
    # Wide-P path: grid = (row tiles [parallel], K tiles [arbitrary, last]).
    k = pl.program_id(1)

    @pl.when(k == 0)
    def _():
        acc_ref[...] = jnp.zeros_like(acc_ref)

    # The tail K block of x may be partial; its out-of-bounds columns are
    # undefined (NOT zero), so mask them to exact zeros.  w is zero-padded in
    # the wrapper, so 0 * 0 contributes nothing (NaN-safe).
    col = k * tile_k + jax.lax.broadcasted_iota(jnp.int32, x_ref.shape, 1)
    x = jnp.where(col < p, x_ref[...], 0.0)
    acc_ref[...] += _matvec(x, w_ref[...])

    @pl.when(k == pl.num_programs(1) - 1)
    def _():
        o_ref[...] = acc_ref[...] + b_ref[0, 0]


def _regression_pallas(x, weight, bias, *, tile_n=None, tile_k=None,
                       vmem_budget_bytes=16 * 1024 * 1024,
                       step_bytes_target=4 * 1024 * 1024):
    """Pallas path: y = x @ W.T + b with an N-tiled (optionally K-tiled) grid."""
    if x.dtype not in (jnp.float32, jnp.bfloat16):
        x = x.astype(jnp.float32)
    n, p = x.shape
    sub = 8 if x.dtype == jnp.float32 else 16        # sublane packing f32/bf16
    itemsize = x.dtype.itemsize
    row_bytes = max(p, 1) * itemsize

    w = weight.astype(x.dtype).reshape(p, 1)          # (1, p) -> (p, 1)
    b = bias.astype(jnp.float32).reshape(1, 1)        # SMEM scalar

    # Rows of a double-buffered full-width x tile that fit the VMEM budget.
    budget_rows = vmem_budget_bytes // (2 * row_bytes)
    use_k_tiling = (tile_k is not None) or (budget_rows < sub)

    common_params = dict(
        compiler_params=pltpu.CompilerParams(
            dimension_semantics=("parallel",) if not use_k_tiling
            else ("parallel", "arbitrary"),
            vmem_limit_bytes=32 * 1024 * 1024,
        ),
    )

    if not use_k_tiling:
        if tile_n is None:
            # >= ~4 MiB of x per grid step (amortizes the ~0.35 us/step
            # pipeline overhead on v7x/v6e), within the double-buffer budget.
            tile_n = min(step_bytes_target // row_bytes, budget_rows)
            # Keep >= 2 row tiles when possible so both v7x TensorCores get
            # work on the "parallel" axis (no-op on v5e/v6e).
            tile_n = min(tile_n, _round_up(pl.cdiv(n, 2), sub))
        tile_n = min(int(tile_n), _round_up(n, sub))
        tile_n = max(sub, (tile_n // sub) * sub)
        grid_n = pl.cdiv(n, tile_n)

        return pl.pallas_call(
            _linear_kernel,
            out_shape=jax.ShapeDtypeStruct((n, 1), jnp.float32),
            grid_spec=pltpu.PrefetchScalarGridSpec(
                num_scalar_prefetch=0,
                grid=(grid_n,),
                in_specs=[
                    pl.BlockSpec((tile_n, p), lambda i: (i, 0)),     # x tiles
                    pl.BlockSpec((p, 1), lambda i: (0, 0)),          # resident W
                    pl.BlockSpec(memory_space=pltpu.MemorySpace.SMEM),  # bias
                ],
                out_specs=pl.BlockSpec((tile_n, 1), lambda i: (i, 0)),
            ),
            cost_estimate=pl.CostEstimate(
                flops=2 * n * p,
                transcendentals=0,
                bytes_accessed=itemsize * (n * p + p) + 4 * n,
            ),
            **common_params,
        )(x, w, b)

    # ---- Wide-P fallback: K-tiled accumulation ----
    if tile_n is None:
        tile_n = min(256, _round_up(pl.cdiv(n, 2), sub))
    tile_n = min(int(tile_n), _round_up(n, sub))
    tile_n = max(sub, (tile_n // sub) * sub)
    if tile_k is None:
        tile_k = min(step_bytes_target // (tile_n * itemsize),
                     vmem_budget_bytes // (2 * tile_n * itemsize))
    tile_k = max(128, (int(tile_k) // 128) * 128)
    tile_k = min(tile_k, _round_up(max(p, 1), 128))
    grid_n = pl.cdiv(n, tile_n)
    grid_k = pl.cdiv(p, tile_k)

    # Zero-pad only the tiny weight vector (negligible bytes) so every
    # (tile_k, 1) block of w is fully defined; x itself is NOT padded.
    p_w = grid_k * tile_k
    w = jnp.pad(w, ((0, p_w - p), (0, 0)))

    kernel = functools.partial(_linear_ktiled_kernel, p=p, tile_k=tile_k)
    return pl.pallas_call(
        kernel,
        out_shape=jax.ShapeDtypeStruct((n, 1), jnp.float32),
        grid_spec=pltpu.PrefetchScalarGridSpec(
            num_scalar_prefetch=0,
            grid=(grid_n, grid_k),                    # reduction axis last
            in_specs=[
                pl.BlockSpec((tile_n, tile_k), lambda i, k: (i, k)),  # x
                pl.BlockSpec((tile_k, 1), lambda i, k: (k, 0)),       # W slice
                pl.BlockSpec(memory_space=pltpu.MemorySpace.SMEM),    # bias
            ],
            out_specs=pl.BlockSpec((tile_n, 1), lambda i, k: (i, 0)),
            scratch_shapes=[pltpu.VMEM((tile_n, 1), jnp.float32)],    # acc
        ),
        cost_estimate=pl.CostEstimate(
            flops=2 * n * p,
            transcendentals=0,
            bytes_accessed=itemsize * (n * p + p_w) + 4 * n,
        ),
        **common_params,
    )(x, w, b)


def regression_model_forward(x, weight, bias, *, tile_n=None, tile_k=None,
                             size_threshold=1 << 20):
    """nn.Linear(p, 1) forward.

    Tiny problems (e.g. the module default p=1, n=8) go through a fused XLA
    op — a single pallas_call launch costs more than the whole matvec.
    Large, HBM-bound problems use the tiled Pallas kernel.
    """
    n, p_in = x.shape
    if n * p_in < size_threshold:
        return (x.astype(jnp.float32) @ weight.astype(jnp.float32).T
                + bias.astype(jnp.float32)).reshape(n, 1)
    return _regression_pallas(x, weight, bias, tile_n=tile_n, tile_k=tile_k)


if __name__ == "__main__":
    key = jax.random.PRNGKey(0)

    def run_case(n, p_feat, *, tile_n=None, tile_k=None, dtype=jnp.float32,
                 force_pallas=True, tol=1e-5):
        k = jax.random.fold_in(key, n * 1009 + p_feat)
        k_x, k_w, k_b = jax.random.split(k, 3)
        # Mimic torch.nn.Linear default init: U(-1/sqrt(p), 1/sqrt(p)).
        bound = 1.0 / (p_feat ** 0.5)
        weight = jax.random.uniform(k_w, (1, p_feat), jnp.float32, -bound, bound)
        bias = jax.random.uniform(k_b, (1,), jnp.float32, -bound, bound)
        x = jax.random.normal(k_x, (n, p_feat), jnp.float32).astype(dtype)

        if force_pallas:
            y = _regression_pallas(x, weight, bias, tile_n=tile_n, tile_k=tile_k)
        else:
            y = regression_model_forward(x, weight, bias,
                                         tile_n=tile_n, tile_k=tile_k)
        y = jax.block_until_ready(y)

        w_eff = weight.astype(dtype).astype(jnp.float32)
        y_ref = x.astype(jnp.float32) @ w_eff.T + bias
        assert y.shape == (n, 1), y.shape
        assert jnp.allclose(y, y_ref, atol=tol, rtol=tol), (n, p_feat, str(dtype))

    # Module-default shape (p=1, small batch) forced through the kernel:
    # exercises the tiny-K VPU path, un-padded P=1, single row tile.
    run_case(8, 1)
    # Ragged N, un-padded P=96: 2 pipelined row tiles with a partial tail
    # tile, K=96 MXU matvec, no wrapper-side padding of x.
    run_case(300, 96)
    # bf16 activations delivered by the producer; f32 MXU accumulation.
    run_case(256, 128, dtype=jnp.bfloat16, tol=2e-3)
    # Forced K-tiling path: ragged P=300 with tile_k=128 -> 3 K steps,
    # in-kernel tail-column masking + zero-padded weight + VMEM accumulator.
    run_case(64, 300, tile_n=32, tile_k=128)
    # Dispatcher sanity: tiny problem takes the fused-XLA path.
    run_case(8, 1, force_pallas=False)

    print("KERNEL_OK")
</pallas_src>

<mosaic_0001>
module attributes {stable_mosaic.version = 11 : i64} {
  func.func @_linear_kernel(%arg0: i32, %arg1: memref<8x1xf32, #tpu.memory_space<vmem>>, %arg2: memref<1x1xf32, #tpu.memory_space<vmem>>, %arg3: memref<1x1xf32, #tpu.memory_space<smem>>, %arg4: memref<8x1xf32, #tpu.memory_space<vmem>>) attributes {dimension_semantics = [#tpu.dimension_semantics<parallel>], iteration_bounds = array<i64: 1>, scalar_prefetch = 0 : i64, scratch_operands = 0 : i64, tpu.core_type = #tpu.core_type<tc>, window_params = [{transform_indices = @transform_0, window_bounds = array<i64: 8, 1>}, {pipeline_mode = #tpu.pipeline_mode<synchronous>, transform_indices = @transform_1, window_bounds = array<i64: 1, 1>}, {transform_indices = @transform_2, window_bounds = array<i64: 1, 1>}, {transform_indices = @transform_3, window_bounds = array<i64: 8, 1>}]} {
    %c0 = arith.constant 0 : index
    %c0_0 = arith.constant 0 : index
    %0 = vector.load %arg1[%c0, %c0_0] : memref<8x1xf32, #tpu.memory_space<vmem>>, vector<8x1xf32>
    %c0_1 = arith.constant 0 : index
    %c0_2 = arith.constant 0 : index
    %1 = vector.load %arg2[%c0_1, %c0_2] : memref<1x1xf32, #tpu.memory_space<vmem>>, vector<1x1xf32>
    %2 = vector.broadcast %1 : vector<1x1xf32> to vector<8x1xf32>
    %3 = arith.mulf %0, %2 : vector<8x1xf32>
    %c0_3 = arith.constant 0 : index
    %c0_4 = arith.constant 0 : index
    %4 = memref.load %arg3[%c0_3, %c0_4] : memref<1x1xf32, #tpu.memory_space<smem>>
    %5 = vector.broadcast %4 : f32 to vector<8x1xf32>
    %6 = arith.addf %3, %5 : vector<8x1xf32>
    %c0_5 = arith.constant 0 : index
    %c0_6 = arith.constant 0 : index
    %7 = vector.load %arg4[%c0_5, %c0_6] : memref<8x1xf32, #tpu.memory_space<vmem>>, vector<8x1xf32>
    tpu.vector_store %arg4[%c0_5, %c0_6], %6 {strides = array<i32>} : memref<8x1xf32, #tpu.memory_space<vmem>>, vector<8x1xf32>,
    return
  }
  func.func @transform_0(%arg0: i32) -> (i32, i32) {
    %c0_i32 = arith.constant 0 : i32
    %c0_i32_0 = arith.constant 0 : i32
    return %arg0, %c0_i32 : i32, i32
  }
  func.func @transform_1(%arg0: i32) -> (i32, i32) {
    %c0_i32 = arith.constant 0 : i32
    %c0_i32_0 = arith.constant 0 : i32
    %c0_i32_1 = arith.constant 0 : i32
    return %c0_i32, %c0_i32_0 : i32, i32
  }
  func.func @transform_2(%arg0: i32) -> (i32, i32) {
    %c0_i32 = arith.constant 0 : i32
    %c0_i32_0 = arith.constant 0 : i32
    %c0_i32_1 = arith.constant 0 : i32
    return %c0_i32, %c0_i32_0 : i32, i32
  }
  func.func @transform_3(%arg0: i32) -> (i32, i32) {
    %c0_i32 = arith.constant 0 : i32
    %c0_i32_0 = arith.constant 0 : i32
    return %arg0, %c0_i32 : i32, i32
  }
}

</mosaic_0001>

<bundles_post_ra>
// kernel: tpu_custom_call.1
= control target key start
LH: loop header
LB: loop body
LE: loop exit
PB: predicated region body
PF: predicated region fallthrough
CT: control target
= control target key end

     0   :  { %vm29_vm0 = vcmask 7168   ;;  %s68_s1 = inlined_call_operand.<no memory space> [shape: f32[1,1], index: 1, kind: input, shape index: {}]   ;;  %s69_s0 = inlined_call_operand.vmem [shape: f32[8,1], index: 0, kind: input, shape index: {}]   ;;  %s70_s2 = inlined_call_operand.<no memory space> [shape: f32[1,1], index: 2, kind: input, shape index: {}]   ;;  %s71_s3 = inlined_call_operand.vmem [shape: f32[8,1], index: 3, kind: output, shape index: {}]  }
   0x1   :  { %v8_v0 = vstv %s68_s1  ;;  %v17_v1 = vld [vmem:[%s69_s0] sm:$0xff]  ;;  %v27_v3 = vstv %s70_s2 }
   0x2   :  { %9 = vst [vmem:[#allocation2] sm:$0x1] %v8_v0 }
   0x9   :  { %v35_v2 = vld [vmem:[#allocation2] ss:$0 sm:$0xff] }
   0xa   :  { %v25_v4 = vmul.f32 %v35_v2, %v17_v1 }
   0xc   :  { %v28_v5 = vadd.f32 %v27_v3, %v25_v4 }
   0xe   :  { %30 = vst.msk [vmem:[%s71_s3] sm:$0xff] %vm29_vm0, %v28_v5 }

</bundles_post_ra>
